<compile_context>
chip_gen: v7x
topology: tpu7x:2x2x1
jax: 0.10.0
libtpu: 0.0.40
codegen_flags: <defaults>
</compile_context>

<pallas_src>
import jax
import jax.numpy as jnp
from jax.experimental import pallas as pl
from jax.experimental.pallas import tpu as pltpu

INPUT_DIM = 1
HIDDEN_DIM = 10
OUTPUT_DIM = 1
N_LAYERS = 1


def rnn_fc_kernel(data_ref, p_ref, out_ref):
    # data_ref: (B, T+H)  -- columns [0:T] = x (I=1 squeezed), columns [T:T+H] = h0
    # p_ref:    (H+4, H)  -- rows [0:H] = W_hh^T, [H] = w_ih row, [H+1] = b_ih+b_hh,
    #                        [H+2] = fc_w row, [H+3] = fc_b broadcast row
    # out_ref:  (T+B, H)  -- rows [0:T] = fc output broadcast over lanes, rows [T:T+B] = final hidden
    B = data_ref.shape[0]
    H = p_ref.shape[1]
    T = data_ref.shape[1] - H

    data = data_ref[...]                       # (B, T+H)  single load
    xv = data[:, :T]                           # (B, T)
    h = data[:, T:]                            # (B, H)  initial hidden (stays in vregs)

    p = p_ref[...]                             # (H+4, H)  single load
    whh_t = p[0:H, :]                          # (H, H)
    wih_row = p[H:H + 1, :]                    # (1, H)
    bias = p[H + 1:H + 2, :]                   # (1, H)
    fcw_row = p[H + 2:H + 3, :]                # (1, H)
    fcb = p[H + 3:H + 4, 0:1]                  # (1, 1)

    # Input projection off the MXU (I == 1): per-step VPU broadcast multiply + bias.
    # Independent of h -> off the serialized recurrence chain.
    xproj = [xv[:, t:t + 1] * wih_row + bias for t in range(T)]        # each (B, H)

    # Recurrence: fully unrolled; only dot + add + tanh on the serial path.
    # TODO(synk): hold W_hh^T resident in MXU weight registers via
    # pltpu.matmul_push_rhs / matmul_acc_lhs / matmul_pop (MRB-addressed pops on
    # v7x) to avoid the per-step RHS re-push; kept on jnp.dot here for
    # portability / lowering safety at (2,10)x(10,10).
    last_rows = []
    for t in range(T):
        pre = xproj[t] + jnp.dot(h, whh_t, preferred_element_type=jnp.float32)
        h = jnp.tanh(pre)
        last_rows.append(h[B - 1:B, :])        # output[-1] = last batch element's trajectory

    hlast = jnp.concatenate(last_rows, axis=0)                         # (T, H), pure vreg traffic

    # FC head off the MXU (O == 1): VPU multiply + XLU lane reduction.
    out_vals = jnp.sum(hlast * fcw_row, axis=-1, keepdims=True) + fcb  # (T, 1)

    # Single dense (T+B, H) store: out broadcast along lanes, then final hidden.
    out_ref[...] = jnp.concatenate(
        [jnp.broadcast_to(out_vals, (T, H)), h], axis=0)


def pack_params(params):
    """Pack all weights/biases into one (H+4, H) f32 slab (done once, outside the hot path)."""
    H = params["w_hh"].shape[0]
    whh_t = params["w_hh"].T                                           # (H, H)
    wih_row = params["w_ih"].reshape(1, H)                             # (H, 1) -> (1, H)
    b = (params["b_ih"] + params["b_hh"]).reshape(1, H)                # (1, H)
    fcw_row = params["fc_w"].reshape(1, H)                             # (1, H)
    fcb_row = jnp.broadcast_to(params["fc_b"].reshape(1, 1), (1, H))   # (1, H)
    return jnp.concatenate([whh_t, wih_row, b, fcw_row, fcb_row],
                           axis=0).astype(jnp.float32)                 # (H+4, H)


@jax.jit
def rnn_forward(x, hidden, packed):
    """x: (B, T, input_dim=1) float32 (batch_first). hidden: (n_layers, B, H) or None.
    packed: (H+4, H) from pack_params.  Returns (fc(output[-1]) : (T, 1), hidden : (1, B, H))."""
    B, T, _ = x.shape
    H = packed.shape[1]

    x2d = x.astype(jnp.float32).reshape(B, T)                          # I == 1: free reshape
    h0 = (jnp.zeros((B, H), jnp.float32) if hidden is None
          else hidden[0].astype(jnp.float32))
    data = jnp.concatenate([x2d, h0], axis=1)                          # (B, T+H)

    vmem = pl.BlockSpec(memory_space=pltpu.MemorySpace.VMEM)
    slab = pl.pallas_call(
        rnn_fc_kernel,
        out_shape=jax.ShapeDtypeStruct((T + B, H), jnp.float32),
        in_specs=[vmem, vmem],
        out_specs=vmem,
    )(data, packed)

    out = slab[:T, 0:OUTPUT_DIM]                                       # (T, 1)
    hid = slab[T:T + B, :].reshape(N_LAYERS, B, H)                     # (1, B, H)
    return out, hid


def rnn_forward_ref(x, hidden, params):
    """Pure-JAX reference (mirrors PyTorch nn.RNN + nn.Linear)."""
    B, T, _ = x.shape
    H = params["w_hh"].shape[0]
    if hidden is None:
        hidden = jnp.zeros((N_LAYERS, B, H), jnp.float32)
    h = hidden[0]
    outs = []
    for t in range(T):
        h = jnp.tanh(x[:, t, :] @ params["w_ih"].T + params["b_ih"]
                     + h @ params["w_hh"].T + params["b_hh"])
        outs.append(h)
    output = jnp.stack(outs, axis=1)                                   # (B, T, H)
    last = output[-1]                                                  # (T, H): last batch element
    out = last @ params["fc_w"].T + params["fc_b"]                     # (T, O)
    return out, h[None]


def init_params(key):
    k = 1.0 / jnp.sqrt(jnp.float32(HIDDEN_DIM))
    keys = jax.random.split(key, 6)
    return {
        "w_ih": jax.random.uniform(keys[0], (HIDDEN_DIM, INPUT_DIM), jnp.float32, -k, k),
        "w_hh": jax.random.uniform(keys[1], (HIDDEN_DIM, HIDDEN_DIM), jnp.float32, -k, k),
        "b_ih": jax.random.uniform(keys[2], (HIDDEN_DIM,), jnp.float32, -k, k),
        "b_hh": jax.random.uniform(keys[3], (HIDDEN_DIM,), jnp.float32, -k, k),
        "fc_w": jax.random.uniform(keys[4], (OUTPUT_DIM, HIDDEN_DIM), jnp.float32, -k, k),
        "fc_b": jax.random.uniform(keys[5], (OUTPUT_DIM,), jnp.float32, -k, k),
    }


if __name__ == "__main__":
    key = jax.random.PRNGKey(0)
    pkey, xkey = jax.random.split(key)
    params = init_params(pkey)
    packed = pack_params(params)

    B, T = 2, 8
    x = jax.random.normal(xkey, (B, T, INPUT_DIM), jnp.float32)
    hidden = None  # same as the original script's global `hidden = None`

    out, hid = rnn_forward(x, hidden, packed)
    out = jax.block_until_ready(out)
    hid = jax.block_until_ready(hid)

    out_ref, hid_ref = rnn_forward_ref(x, hidden, params)
    assert out.shape == (T, OUTPUT_DIM)
    assert hid.shape == (N_LAYERS, B, HIDDEN_DIM)
    assert jnp.allclose(out, out_ref, rtol=1e-5, atol=1e-5)
    assert jnp.allclose(hid, hid_ref, rtol=1e-5, atol=1e-5)

    print("KERNEL_OK")
</pallas_src>

<mosaic_0001>
module attributes {stable_mosaic.version = 11 : i64} {
  func.func @rnn_fc_kernel(%arg0: memref<2x18xf32, #tpu.memory_space<vmem>>, %arg1: memref<14x10xf32, #tpu.memory_space<vmem>>, %arg2: memref<10x10xf32, #tpu.memory_space<vmem>>) attributes {dimension_semantics = [], scalar_prefetch = 0 : i64, scratch_operands = 0 : i64, tpu.core_type = #tpu.core_type<tc>} {
    %c0 = arith.constant 0 : index
    %c0_0 = arith.constant 0 : index
    %0 = vector.load %arg0[%c0, %c0_0] : memref<2x18xf32, #tpu.memory_space<vmem>>, vector<2x18xf32>
    %1 = vector.extract_strided_slice %0 {offsets = [0, 0], sizes = [2, 8], strides = [1, 1]} : vector<2x18xf32> to vector<2x8xf32>
    %2 = vector.extract_strided_slice %0 {offsets = [0, 8], sizes = [2, 10], strides = [1, 1]} : vector<2x18xf32> to vector<2x10xf32>
    %c0_1 = arith.constant 0 : index
    %c0_2 = arith.constant 0 : index
    %3 = vector.load %arg1[%c0_1, %c0_2] : memref<14x10xf32, #tpu.memory_space<vmem>>, vector<14x10xf32>
    %4 = vector.extract_strided_slice %3 {offsets = [0, 0], sizes = [10, 10], strides = [1, 1]} : vector<14x10xf32> to vector<10x10xf32>
    %5 = vector.extract_strided_slice %3 {offsets = [10, 0], sizes = [1, 10], strides = [1, 1]} : vector<14x10xf32> to vector<1x10xf32>
    %6 = vector.extract_strided_slice %3 {offsets = [11, 0], sizes = [1, 10], strides = [1, 1]} : vector<14x10xf32> to vector<1x10xf32>
    %7 = vector.extract_strided_slice %3 {offsets = [12, 0], sizes = [1, 10], strides = [1, 1]} : vector<14x10xf32> to vector<1x10xf32>
    %8 = vector.extract_strided_slice %3 {offsets = [13, 0], sizes = [1, 1], strides = [1, 1]} : vector<14x10xf32> to vector<1x1xf32>
    %9 = vector.extract_strided_slice %1 {offsets = [0, 0], sizes = [2, 1], strides = [1, 1]} : vector<2x8xf32> to vector<2x1xf32>
    %10 = vector.broadcast %9 : vector<2x1xf32> to vector<2x10xf32>
    %11 = vector.broadcast %5 : vector<1x10xf32> to vector<2x10xf32>
    %12 = arith.mulf %10, %11 : vector<2x10xf32>
    %13 = vector.broadcast %6 : vector<1x10xf32> to vector<2x10xf32>
    %14 = arith.addf %12, %13 : vector<2x10xf32>
    %15 = vector.extract_strided_slice %1 {offsets = [0, 1], sizes = [2, 1], strides = [1, 1]} : vector<2x8xf32> to vector<2x1xf32>
    %16 = vector.broadcast %15 : vector<2x1xf32> to vector<2x10xf32>
    %17 = vector.broadcast %5 : vector<1x10xf32> to vector<2x10xf32>
    %18 = arith.mulf %16, %17 : vector<2x10xf32>
    %19 = vector.broadcast %6 : vector<1x10xf32> to vector<2x10xf32>
    %20 = arith.addf %18, %19 : vector<2x10xf32>
    %21 = vector.extract_strided_slice %1 {offsets = [0, 2], sizes = [2, 1], strides = [1, 1]} : vector<2x8xf32> to vector<2x1xf32>
    %22 = vector.broadcast %21 : vector<2x1xf32> to vector<2x10xf32>
    %23 = vector.broadcast %5 : vector<1x10xf32> to vector<2x10xf32>
    %24 = arith.mulf %22, %23 : vector<2x10xf32>
    %25 = vector.broadcast %6 : vector<1x10xf32> to vector<2x10xf32>
    %26 = arith.addf %24, %25 : vector<2x10xf32>
    %27 = vector.extract_strided_slice %1 {offsets = [0, 3], sizes = [2, 1], strides = [1, 1]} : vector<2x8xf32> to vector<2x1xf32>
    %28 = vector.broadcast %27 : vector<2x1xf32> to vector<2x10xf32>
    %29 = vector.broadcast %5 : vector<1x10xf32> to vector<2x10xf32>
    %30 = arith.mulf %28, %29 : vector<2x10xf32>
    %31 = vector.broadcast %6 : vector<1x10xf32> to vector<2x10xf32>
    %32 = arith.addf %30, %31 : vector<2x10xf32>
    %33 = vector.extract_strided_slice %1 {offsets = [0, 4], sizes = [2, 1], strides = [1, 1]} : vector<2x8xf32> to vector<2x1xf32>
    %34 = vector.broadcast %33 : vector<2x1xf32> to vector<2x10xf32>
    %35 = vector.broadcast %5 : vector<1x10xf32> to vector<2x10xf32>
    %36 = arith.mulf %34, %35 : vector<2x10xf32>
    %37 = vector.broadcast %6 : vector<1x10xf32> to vector<2x10xf32>
    %38 = arith.addf %36, %37 : vector<2x10xf32>
    %39 = vector.extract_strided_slice %1 {offsets = [0, 5], sizes = [2, 1], strides = [1, 1]} : vector<2x8xf32> to vector<2x1xf32>
    %40 = vector.broadcast %39 : vector<2x1xf32> to vector<2x10xf32>
    %41 = vector.broadcast %5 : vector<1x10xf32> to vector<2x10xf32>
    %42 = arith.mulf %40, %41 : vector<2x10xf32>
    %43 = vector.broadcast %6 : vector<1x10xf32> to vector<2x10xf32>
    %44 = arith.addf %42, %43 : vector<2x10xf32>
    %45 = vector.extract_strided_slice %1 {offsets = [0, 6], sizes = [2, 1], strides = [1, 1]} : vector<2x8xf32> to vector<2x1xf32>
    %46 = vector.broadcast %45 : vector<2x1xf32> to vector<2x10xf32>
    %47 = vector.broadcast %5 : vector<1x10xf32> to vector<2x10xf32>
    %48 = arith.mulf %46, %47 : vector<2x10xf32>
    %49 = vector.broadcast %6 : vector<1x10xf32> to vector<2x10xf32>
    %50 = arith.addf %48, %49 : vector<2x10xf32>
    %51 = vector.extract_strided_slice %1 {offsets = [0, 7], sizes = [2, 1], strides = [1, 1]} : vector<2x8xf32> to vector<2x1xf32>
    %52 = vector.broadcast %51 : vector<2x1xf32> to vector<2x10xf32>
    %53 = vector.broadcast %5 : vector<1x10xf32> to vector<2x10xf32>
    %54 = arith.mulf %52, %53 : vector<2x10xf32>
    %55 = vector.broadcast %6 : vector<1x10xf32> to vector<2x10xf32>
    %56 = arith.addf %54, %55 : vector<2x10xf32>
    %cst = arith.constant dense<0.000000e+00> : vector<2x10xf32>
    %57 = tpu.matmul %2, %4, %cst {dimension_numbers = #tpu.dot_dimension_numbers<[1], [0], [0], [1], [0, 0, 1, 1], [], []>} : vector<2x10xf32>, vector<10x10xf32>, vector<2x10xf32> -> vector<2x10xf32>
    %58 = arith.addf %14, %57 : vector<2x10xf32>
    %59 = math.tanh %58 : vector<2x10xf32>
    %60 = vector.extract_strided_slice %59 {offsets = [1, 0], sizes = [1, 10], strides = [1, 1]} : vector<2x10xf32> to vector<1x10xf32>
    %cst_3 = arith.constant dense<0.000000e+00> : vector<2x10xf32>
    %61 = tpu.matmul %59, %4, %cst_3 {dimension_numbers = #tpu.dot_dimension_numbers<[1], [0], [0], [1], [0, 0, 1, 1], [], []>} : vector<2x10xf32>, vector<10x10xf32>, vector<2x10xf32> -> vector<2x10xf32>
    %62 = arith.addf %20, %61 : vector<2x10xf32>
    %63 = math.tanh %62 : vector<2x10xf32>
    %64 = vector.extract_strided_slice %63 {offsets = [1, 0], sizes = [1, 10], strides = [1, 1]} : vector<2x10xf32> to vector<1x10xf32>
    %cst_4 = arith.constant dense<0.000000e+00> : vector<2x10xf32>
    %65 = tpu.matmul %63, %4, %cst_4 {dimension_numbers = #tpu.dot_dimension_numbers<[1], [0], [0], [1], [0, 0, 1, 1], [], []>} : vector<2x10xf32>, vector<10x10xf32>, vector<2x10xf32> -> vector<2x10xf32>
    %66 = arith.addf %26, %65 : vector<2x10xf32>
    %67 = math.tanh %66 : vector<2x10xf32>
    %68 = vector.extract_strided_slice %67 {offsets = [1, 0], sizes = [1, 10], strides = [1, 1]} : vector<2x10xf32> to vector<1x10xf32>
    %cst_5 = arith.constant dense<0.000000e+00> : vector<2x10xf32>
    %69 = tpu.matmul %67, %4, %cst_5 {dimension_numbers = #tpu.dot_dimension_numbers<[1], [0], [0], [1], [0, 0, 1, 1], [], []>} : vector<2x10xf32>, vector<10x10xf32>, vector<2x10xf32> -> vector<2x10xf32>
    %70 = arith.addf %32, %69 : vector<2x10xf32>
    %71 = math.tanh %70 : vector<2x10xf32>
    %72 = vector.extract_strided_slice %71 {offsets = [1, 0], sizes = [1, 10], strides = [1, 1]} : vector<2x10xf32> to vector<1x10xf32>
    %cst_6 = arith.constant dense<0.000000e+00> : vector<2x10xf32>
    %73 = tpu.matmul %71, %4, %cst_6 {dimension_numbers = #tpu.dot_dimension_numbers<[1], [0], [0], [1], [0, 0, 1, 1], [], []>} : vector<2x10xf32>, vector<10x10xf32>, vector<2x10xf32> -> vector<2x10xf32>
    %74 = arith.addf %38, %73 : vector<2x10xf32>
    %75 = math.tanh %74 : vector<2x10xf32>
    %76 = vector.extract_strided_slice %75 {offsets = [1, 0], sizes = [1, 10], strides = [1, 1]} : vector<2x10xf32> to vector<1x10xf32>
    %cst_7 = arith.constant dense<0.000000e+00> : vector<2x10xf32>
    %77 = tpu.matmul %75, %4, %cst_7 {dimension_numbers = #tpu.dot_dimension_numbers<[1], [0], [0], [1], [0, 0, 1, 1], [], []>} : vector<2x10xf32>, vector<10x10xf32>, vector<2x10xf32> -> vector<2x10xf32>
    %78 = arith.addf %44, %77 : vector<2x10xf32>
    %79 = math.tanh %78 : vector<2x10xf32>
    %80 = vector.extract_strided_slice %79 {offsets = [1, 0], sizes = [1, 10], strides = [1, 1]} : vector<2x10xf32> to vector<1x10xf32>
    %cst_8 = arith.constant dense<0.000000e+00> : vector<2x10xf32>
    %81 = tpu.matmul %79, %4, %cst_8 {dimension_numbers = #tpu.dot_dimension_numbers<[1], [0], [0], [1], [0, 0, 1, 1], [], []>} : vector<2x10xf32>, vector<10x10xf32>, vector<2x10xf32> -> vector<2x10xf32>
    %82 = arith.addf %50, %81 : vector<2x10xf32>
    %83 = math.tanh %82 : vector<2x10xf32>
    %84 = vector.extract_strided_slice %83 {offsets = [1, 0], sizes = [1, 10], strides = [1, 1]} : vector<2x10xf32> to vector<1x10xf32>
    %cst_9 = arith.constant dense<0.000000e+00> : vector<2x10xf32>
    %85 = tpu.matmul %83, %4, %cst_9 {dimension_numbers = #tpu.dot_dimension_numbers<[1], [0], [0], [1], [0, 0, 1, 1], [], []>} : vector<2x10xf32>, vector<10x10xf32>, vector<2x10xf32> -> vector<2x10xf32>
    %86 = arith.addf %56, %85 : vector<2x10xf32>
    %87 = math.tanh %86 : vector<2x10xf32>
    %88 = vector.extract_strided_slice %87 {offsets = [1, 0], sizes = [1, 10], strides = [1, 1]} : vector<2x10xf32> to vector<1x10xf32>
    %89 = tpu.concatenate %60, %64, %68, %72, %76, %80, %84, %88 in 0 : vector<1x10xf32>, vector<1x10xf32>, vector<1x10xf32>, vector<1x10xf32>, vector<1x10xf32>, vector<1x10xf32>, vector<1x10xf32>, vector<1x10xf32> -> vector<8x10xf32>
    %90 = vector.broadcast %7 : vector<1x10xf32> to vector<8x10xf32>
    %91 = arith.mulf %89, %90 : vector<8x10xf32>
    %cst_10 = arith.constant dense<0.000000e+00> : vector<8xf32>
    %92 = vector.multi_reduction <add>, %91, %cst_10 [1] : vector<8x10xf32> to vector<8xf32>
    %93 = vector.shape_cast %92 : vector<8xf32> to vector<8x1xf32>
    %94 = vector.broadcast %8 : vector<1x1xf32> to vector<8x1xf32>
    %95 = arith.addf %93, %94 : vector<8x1xf32>
    %96 = vector.shape_cast %95 : vector<8x1xf32> to vector<8x1xf32>
    %97 = vector.broadcast %96 : vector<8x1xf32> to vector<8x10xf32>
    %98 = tpu.concatenate %97, %87 in 0 : vector<8x10xf32>, vector<2x10xf32> -> vector<10x10xf32>
    %c0_11 = arith.constant 0 : index
    %c0_12 = arith.constant 0 : index
    %99 = vector.load %arg2[%c0_11, %c0_12] : memref<10x10xf32, #tpu.memory_space<vmem>>, vector<10x10xf32>
    tpu.vector_store %arg2[%c0_11, %c0_12], %98 {strides = array<i32>} : memref<10x10xf32, #tpu.memory_space<vmem>>, vector<10x10xf32>,
    return
  }
}

</mosaic_0001>

<bundles_post_ra>
// kernel: rnn_forward.1
= control target key start
LH: loop header
LB: loop body
LE: loop exit
PB: predicated region body
PF: predicated region fallthrough
CT: control target
= control target key end

     0   :  { %7 = vsyncpa [#allocation3], 0  ;;  %s938_s9 = smov [#allocation2]   ;;  %s1102_s0 = inlined_call_operand.vmem [shape: f32[2,18], index: 0, kind: input, shape index: {}]   ;;  %s1103_s1 = inlined_call_operand.hbm [shape: f32[14,10], index: 1, kind: input, shape index: {}]   ;;  %s1104_s2 = inlined_call_operand.vmem [shape: f32[10,10], index: 2, kind: output, shape index: {}]  }
   0x1   :  { %s15_s10 = sshll.u32 %s938_s9, 4  ;;  %s914_s13 = scalar_lea.hbm %s1103_s1, 256  ;;  %s16_s10 = int_to_ptr.vmem [resolvable:$true] %s15_s10 }
   0x2   :  { %p915_p0 = scmp.ne.s32.totalorder %s1103_s1, %s914_s13  ;;  %p918_p1 = scmp.lt.u32.totalorder %s914_s13, %s1103_s1 }
   0x4   :  { %p920_p2 = pnand %p918_p1, %p915_p0 }
   0x6   :  { %923 = shalt.err (!%p920_p2)
}
   0x7   :  { %s924_s18 = scalar_lea.vmem %s16_s10, 256  ;;  %p929_p4 = scmp.lt.s32.totalorder %s16_s10, %s16_s10 }
   0x8   :  { %p925_p3 = scmp.ne.s32.totalorder %s16_s10, %s924_s18  ;;  %p930_p5 = scmp.lt.s32.totalorder %s924_s18, %s924_s18 }
   0xa   :  { %p931_p6 = por %p930_p5, %p929_p4 }
   0xc   :  { %p932_p7 = pnand %p931_p6, %p925_p3 }
   0xe   :  { %935 = shalt.err (!%p932_p7)
}
   0xf   :  { %s939_s19 = smov 128   ;;  %s940_s20 = smov 8  }
  0x10   :  { %21 = dma.hbm_to_vmem [thread:$0]  %s1103_s1, 256, %s16_s10, [#allocation3], %s939_s19, %s939_s19, %s940_s20  }
  0x11   :  { %936 = dma.done.wait [#allocation3], 256  }
  0x12   :  { %937 = vsyncadd [#allocation3], 4294967040  ;;  %v941_v0 = vmov 0.0|0.0   ;;  %vm942_vm0 = vmmov 0   ;;  %v943_v1 = vmov 0.0   ;;  %v944_v2 = vmov 0  }
  0x13   :  { %841 = vmatprep.subr.bf16.mxu0 %v941_v0  ;;  %845 = vmatprep.subr.bf16.mxu1 %v941_v0  ;;  %vm90_vm1 = vcmask 1041408   ;;  %vm945_vm2 = vmmov 1   ;;  %v996_v4 = vld [vmem:[%s1102_s0] sm:$0x3]  ;;  %v998_v6 = vld [vmem:[#allocation2 + $0x8] sm:$0x3f]  ;;  %v33_v10 = vlaneseq }
  0x14   :  { %789 = vmatprep.mubr.msk.f32.mxu0 %vm942_vm0, %v943_v1  ;;  %889 = vset.pattern.permute.xlu0 %v944_v2  ;;  %vm989_vm3 = vmpackc.low %vm90_vm1, %vm945_vm2  ;;  %v26_v5 = vld [vmem:[#allocation2] sm:$0xff]  ;;  %s946_s24 = smov 120   ;;  %vm87_vm4 = vcmask 80896   ;;  %v947_v9 = vmov 1   ;;  %v948_v23 = vmov 2   ;;  %vm706_vm5 = vcmask 1040384  }
  0x15   :  { %796 = vmatprep.mubr.msk.f32.mxu1 %vm942_vm0, %v943_v1  ;;  %85 = vrot.lane.b32.xlu0 %v996_v4, %s946_s24  ;;  %v1002_v7 = vpack.c.bf16 %v998_v6, %v26_v5  ;;  %v1021_v11 = vshrl.u32 %v33_v10, 7  ;;  %v949_v33 = vmov 3   ;;  %v950_v43 = vmov 4  }
  0x16   :  { %890 = vset.pattern.permute.xlu1 %v947_v9  ;;  %vm709_vm6 = vcmask 1042432   ;;  %v951_v53 = vmov 5   ;;  %vm711_vm7 = vcmask 1043456   ;;  %v952_v63 = vmov 6  }
  0x17   :  { %844 = vmatpush3.bf16.msk.msra.mxu0 %vm989_vm3, %v1002_v7  ;;  %848 = vmatpush3.bf16.msk.msra.mxu1 %vm989_vm3, %v1002_v7  ;;  %v35_v12 = vsub.s32 2, %v1021_v11  ;;  %v40_v14 = vsub.s32 3, %v1021_v11  ;;  %vm713_vm8 = vcmask 1044480   ;;  %vm715_vm9 = vcmask 1045504  }
  0x18   :  { %849 = vmatprep.subr.bf16.mxu0 %v941_v0  ;;  %853 = vmatprep.subr.bf16.mxu1 %v941_v0  ;;  %vm738_vm10 = vcmask 74752   ;;  %vm717_vm11 = vcmask 1046528  }
  0x19   :  { %30 = vperm.xlu0 %889, %v996_v4   ;;  %44 = vperm.xlu1 %890, %v996_v4   ;;  %v1025_v13 = vrot.slane %v998_v6, %v35_v12  ;;  %v1030_v17 = vrot.slane %v998_v6, %v40_v14 }
  0x1d   :  { %891 = vset.pattern.permute.xlu1 %v948_v23  ;;  %893 = vset.pattern.permute.xlu0 %v950_v43 }
  0x1e   :  { %50 = vperm.xlu1 %891, %v996_v4   ;;  %62 = vperm.xlu0 %893, %v996_v4  }
  0x22   :  { %892 = vset.pattern.permute.xlu1 %v949_v33 }
  0x23   :  { %56 = vperm.xlu1 %892, %v996_v4  }
  0x27   :  { %894 = vset.pattern.permute.xlu1 %v951_v53 }
  0x28   :  { %68 = vperm.xlu1 %894, %v996_v4  }
  0x2c   :  { %895 = vset.pattern.permute.xlu1 %v952_v63 }
  0x2d   :  { %74 = vperm.xlu1 %895, %v996_v4  }
  0x87   :  { %v86_v8 = vpop.permute.xlu0 %85 }
  0x88   :  { %790 = vmatmul.mubr.msk.f32.vlgmr.msra.gmra.mrb[0].mxu0 %vm87_vm4, %v86_v8 }
  0x89   :  { %852 = vmatpush3.bf16.msk.msra.mxu0 %vm989_vm3, %v1002_v7  ;;  %803 = vmatprep.mubr.msk.f32.mxu0 %vm942_vm0, %v943_v1 }
  0x8a   :  { %857 = vmatprep.subr.bf16.mxu0 %v941_v0 }
  0x98   :  { %v31_v15 = vpop.permute.xlu0 %30  ;;  %v45_v24 = vpop.permute.xlu1 %44 }
  0x99   :  { %v37_v16 = vmul.f32 %v1025_v13, %v31_v15  ;;  %v47_v25 = vmul.f32 %v45_v24, %v1025_v13 }
  0x9b   :  { %v42_v18 = vadd.f32 %v1030_v17, %v37_v16  ;;  %v48_v26 = vadd.f32 %v47_v25, %v1030_v17 }
  0x9d   :  { %v51_v34 = vpop.permute.xlu1 %50  ;;  %v63_v54 = vpop.permute.xlu0 %62 }
  0x9e   :  { %v53_v35 = vmul.f32 %v51_v34, %v1025_v13  ;;  %v65_v55 = vmul.f32 %v63_v54, %v1025_v13  ;;  %v729_v34 = vsub.s32 5, %v1021_v11 }
  0xa0   :  { %v54_v36 = vadd.f32 %v53_v35, %v1030_v17  ;;  %v66_v56 = vadd.f32 %v65_v55, %v1030_v17  ;;  %v730_v35 = vrot.slane %v998_v6, %v729_v34 }
  0xa2   :  { %v57_v44 = vpop.permute.xlu1 %56 }
  0xa3   :  { %v59_v45 = vmul.f32 %v57_v44, %v1025_v13 }
  0xa5   :  { %v60_v46 = vadd.f32 %v59_v45, %v1030_v17 }
 0x15b   :  { %v160_v19 = vpop.f32.mrb[0].mxu0 }
 0x15c   :  { %v164_v20 = vadd.f32 %v160_v19, %v42_v18  ;;  %v791_v21 = vpop.f32.mrb[1].mxu0 }
 0x15e   :  { %898 = vtanh.f32 %v164_v20 }
 0x168   :  { %v899_v22 = vpop.eup %898 }
 0x169   :  { %797 = vmatmul.mubr.msk.f32.vlgmr.msra.gmra.mrb[0].mxu1 %vm87_vm4, %v899_v22  ;;  %v691_v30 = vrot.slane %v899_v22, 1 }
 0x16a   :  { %856 = vmatpush3.bf16.msk.msra.mxu1 %vm989_vm3, %v1002_v7  ;;  %810 = vmatprep.mubr.msk.f32.mxu1 %vm942_vm0, %v943_v1 }
 0x16b   :  { %861 = vmatprep.subr.bf16.mxu1 %v941_v0 }
 0x23c   :  { %v235_v27 = vpop.f32.mrb[0].mxu1 }
 0x23d   :  { %v239_v28 = vadd.f32 %v235_v27, %v48_v26  ;;  %v798_v29 = vpop.f32.mrb[1].mxu1 }
 0x23e   :  { %v721_v29 = vsub.s32 4, %v1021_v11 }
 0x23f   :  { %900 = vtanh.f32 %v239_v28 }
 0x249   :  { %v901_v31 = vpop.eup %900 }
 0x24a   :  { %804 = vmatmul.mubr.msk.f32.vlgmr.msra.gmra.mrb[2].mxu0 %vm87_vm4, %v901_v31  ;;  %v707_v32 = vsel %vm706_vm5, %v691_v30, %v901_v31  ;;  %v722_v31 = vrot.slane %v998_v6, %v721_v29 }
 0x24b   :  { %860 = vmatpush3.bf16.msk.msra.mxu0 %vm989_vm3, %v1002_v7  ;;  %817 = vmatprep.mubr.msk.f32.mxu0 %vm942_vm0, %v943_v1 }
 0x24c   :  { %865 = vmatprep.subr.bf16.mxu0 %v941_v0 }
 0x31d   :  { %v310_v37 = vpop.f32.mrb[2].mxu0 }
 0x31e   :  { %v314_v38 = vadd.f32 %v310_v37, %v54_v36  ;;  %v805_v39 = vpop.f32.mrb[3].mxu0 }
 0x320   :  { %902 = vtanh.f32 %v314_v38 }
 0x32a   :  { %v903_v40 = vpop.eup %902 }
 0x32b   :  { %v693_v41 = vrot.slane %v903_v40, 7  ;;  %811 = vmatmul.mubr.msk.f32.vlgmr.msra.gmra.mrb[2].mxu1 %vm87_vm4, %v903_v40 }
 0x32c   :  { %864 = vmatpush3.bf16.msk.msra.mxu1 %vm989_vm3, %v1002_v7  ;;  %824 = vmatprep.mubr.msk.f32.mxu1 %vm942_vm0, %v943_v1 }
 0x32d   :  { %869 = vmatprep.subr.bf16.mxu1 %v941_v0  ;;  %v708_v42 = vsel %vm90_vm1, %v707_v32, %v693_v41  ;;  %v69_v0 = vpop.permute.xlu1 %68 }
 0x32e   :  { %v71_v5 = vmul.f32 %v69_v0, %v1025_v13 }
 0x330   :  { %v72_v8 = vadd.f32 %v71_v5, %v1030_v17 }
 0x331   :  { %v75_v15 = vpop.permute.xlu1 %74 }
 0x332   :  { %v77_v16 = vmul.f32 %v75_v15, %v1025_v13 }
 0x334   :  { %v78_v18 = vadd.f32 %v77_v16, %v1030_v17 }
 0x3fe   :  { %v385_v47 = vpop.f32.mrb[2].mxu1 }
 0x3ff   :  { %v389_v48 = vadd.f32 %v385_v47, %v60_v46  ;;  %v812_v49 = vpop.f32.mrb[3].mxu1 }
 0x401   :  { %904 = vtanh.f32 %v389_v48 }
 0x40b   :  { %v905_v50 = vpop.eup %904 }
 0x40c   :  { %v695_v51 = vrot.slane %v905_v50, 6  ;;  %818 = vmatmul.mubr.msk.f32.vlgmr.msra.gmra.mrb[4].mxu0 %vm87_vm4, %v905_v50 }
 0x40d   :  { %868 = vmatpush3.bf16.msk.msra.mxu0 %vm989_vm3, %v1002_v7  ;;  %831 = vmatprep.mubr.msk.f32.mxu0 %vm942_vm0, %v943_v1 }
 0x40e   :  { %v710_v52 = vsel %vm709_vm6, %v708_v42, %v695_v51 }
 0x4df   :  { %v460_v57 = vpop.f32.mrb[4].mxu0 }
 0x4e0   :  { %v464_v58 = vadd.f32 %v460_v57, %v66_v56  ;;  %v819_v59 = vpop.f32.mrb[5].mxu0 }
 0x4e2   :  { %906 = vtanh.f32 %v464_v58 }
 0x4ec   :  { %v907_v60 = vpop.eup %906 }
 0x4ed   :  { %v697_v61 = vrot.slane %v907_v60, 5  ;;  %825 = vmatmul.mubr.msk.f32.vlgmr.msra.gmra.mrb[4].mxu1 %vm87_vm4, %v907_v60 }
 0x4ee   :  { %872 = vmatpush3.bf16.msk.msra.mxu1 %vm989_vm3, %v1002_v7  ;;  %838 = vmatprep.mubr.msk.f32.mxu1 %vm942_vm0, %v943_v1  ;;  %v953_v7 = vmov 7  }
 0x4ef   :  { %v712_v62 = vsel %vm711_vm7, %v710_v52, %v697_v61  ;;  %896 = vset.pattern.permute.xlu0 %v953_v7 }
 0x4f0   :  { %80 = vperm.xlu0 %896, %v996_v4  }
 0x4f4   :  { %897 = vset.pattern.permute.xlu0 %v944_v2 }
 0x56f   :  { %v81_v25 = vpop.permute.xlu0 %80 }
 0x570   :  { %v83_v4 = vmul.f32 %v81_v25, %v1025_v13 }
 0x572   :  { %v84_v2 = vadd.f32 %v83_v4, %v1030_v17 }
 0x5c0   :  { %v535_v9 = vpop.f32.mrb[4].mxu1 }
 0x5c1   :  { %v539_v10 = vadd.f32 %v535_v9, %v72_v8  ;;  %v826_v12 = vpop.f32.mrb[5].mxu1 }
 0x5c3   :  { %908 = vtanh.f32 %v539_v10 }
 0x5cd   :  { %v909_v14 = vpop.eup %908 }
 0x5ce   :  { %v699_v3 = vrot.slane %v909_v14, 4  ;;  %832 = vmatmul.mubr.msk.f32.vlgmr.msra.gmra.mrb[6].mxu0 %vm87_vm4, %v909_v14 }
 0x5d0   :  { %v714_v1 = vsel %vm713_vm8, %v712_v62, %v699_v3 }
 0x6a1   :  { %v610_v19 = vpop.f32.mrb[6].mxu0 }
 0x6a2   :  { %v614_v20 = vadd.f32 %v610_v19, %v78_v18  ;;  %v833_v21 = vpop.f32.mrb[7].mxu0 }
 0x6a4   :  { %910 = vtanh.f32 %v614_v20 }
 0x6ae   :  { %v911_v22 = vpop.eup %910 }
 0x6af   :  { %839 = vmatmul.mubr.msk.f32.vlgmr.msra.gmra.mrb[6].mxu1 %vm87_vm4, %v911_v22  ;;  %v701_v23 = vrot.slane %v911_v22, 3 }
 0x6b1   :  { %v716_v24 = vsel %vm715_vm9, %v714_v1, %v701_v23 }
 0x782   :  { %v685_v26 = vpop.f32.mrb[6].mxu1 }
 0x783   :  { %v689_v27 = vadd.f32 %v685_v26, %v84_v2  ;;  %v840_v28 = vpop.f32.mrb[7].mxu1 }
 0x785   :  { %912 = vtanh.f32 %v689_v27 }
 0x78f   :  { %v913_v30 = vpop.eup %912 }
 0x790   :  { %739 = vst.msk [vmem:[%s1104_s2 + $0x8] sm:$0x3] %vm738_vm10, %v913_v30  ;;  %v704_v32 = vrot.slane %v913_v30, 2 }
 0x792   :  { %v718_v33 = vsel %vm717_vm11, %v716_v24, %v704_v32 }
 0x793   :  { %v723_v13 = vmul.f32 %v722_v31, %v718_v33 }
 0x795   :  { %v724_v17 = vsel %vm87_vm4, %v723_v13, 0.0 }
 0x796   :  { %725 = vadd.xlane.f32.xlu1 %v724_v17 }
 0x823   :  { %v726_v36 = vpop.xlane.xlu1 %725 }
 0x824   :  { %v731_v37 = vadd.f32 %v730_v35, %v726_v36 }
 0x826   :  { %734 = vperm.xlu0 %897, %v731_v37  }
 0x8a5   :  { %v735_v38 = vpop.permute.xlu0 %734 }
 0x8a6   :  { %737 = vst.msk [vmem:[%s1104_s2] sm:$0xff] %vm87_vm4, %v735_v38 }
 0x8a7   :  { %744 = vsyncpa [#allocation3], 1 }

</bundles_post_ra>
